<compile_context>
chip_gen: v7x
topology: tpu7x:2x2x1
jax: 0.10.0
libtpu: 0.0.40
codegen_flags: <defaults>
</compile_context>

<pallas_src>
import math

import jax
import jax.numpy as jnp
from jax import lax
from jax.experimental import pallas as pl
from jax.experimental.pallas import tpu as pltpu


# ----------------------------------------------------------------------------
# shared in-kernel helpers
# ----------------------------------------------------------------------------

def _layernorm(x, w, b, eps=1e-5):
    mean = jnp.mean(x, axis=-1, keepdims=True)
    var = jnp.mean((x - mean) ** 2, axis=-1, keepdims=True)
    return (x - mean) * lax.rsqrt(var + eps) * w + b


def _erf_f32(x):
    # Abramowitz & Stegun 7.1.26 polynomial, |err| < 1.5e-7 (exact-erf GELU has no direct
    # Mosaic primitive).  exp() routes to the EUP slot.
    a1, a2, a3, a4, a5 = 0.254829592, -0.284496736, 1.421413741, -1.453152027, 1.061405429
    p = 0.3275911
    sgn = jnp.where(x >= 0.0, 1.0, -1.0)
    ax = jnp.abs(x)
    t = 1.0 / (1.0 + p * ax)
    poly = ((((a5 * t + a4) * t + a3) * t + a2) * t + a1) * t
    return sgn * (1.0 - poly * jnp.exp(-ax * ax))


# ----------------------------------------------------------------------------
# Kernel 1: state-path Pooler (LN -> Linear -> tanh), row-tiled over all tokens
# ----------------------------------------------------------------------------

def _pooler_kernel(x_ref, ln_w_ref, ln_b_ref, w_ref, b_ref, o_ref):
    xn = _layernorm(x_ref[...], ln_w_ref[...], ln_b_ref[...])
    y = jnp.dot(xn.astype(jnp.bfloat16), w_ref[...],
                preferred_element_type=jnp.float32) + b_ref[...]
    o_ref[...] = jnp.tanh(y).astype(o_ref.dtype)


def pooler_forward(x2d, ln_w, ln_b, w, b, *, tile_m=512):
    # x2d: (M, D) = all (batch * seq) state tokens flattened; tiled over rows so the DMA of
    # block i+1 overlaps the matmul of block i (and the axis can shard across v7x cores).
    M, D = x2d.shape
    tm = M if M <= tile_m else tile_m
    inv = lambda i: (0, 0)
    wspec = lambda shape: pl.BlockSpec(shape, inv, pipeline_mode=pl.Buffered(1))
    return pl.pallas_call(
        _pooler_kernel,
        out_shape=jax.ShapeDtypeStruct((M, D), jnp.bfloat16),
        grid=(pl.cdiv(M, tm),),
        in_specs=[
            pl.BlockSpec((tm, D), lambda i: (i, 0)),
            wspec((1, D)),              # ln_w
            wspec((1, D)),              # ln_b
            wspec((D, D)),              # w  (bf16)
            wspec((1, D)),              # b
        ],
        out_specs=pl.BlockSpec((tm, D), lambda i: (i, 0)),
        compiler_params=pltpu.CompilerParams(
            dimension_semantics=("parallel",),
            vmem_limit_bytes=64 * 1024 * 1024),
    )(x2d, ln_w.reshape(1, D), ln_b.reshape(1, D), w.astype(jnp.bfloat16), b.reshape(1, D))


# ----------------------------------------------------------------------------
# Kernel 2: fused action path
#   pooler2 -> BiAttention -> head (Linear+LN+GELU) -> masked mean -> final Linear
# One grid step per action; the matching state (both layouts) is gathered via
# scalar-prefetch index.  All matmuls run in bf16 with f32 accumulation.
# ----------------------------------------------------------------------------

def _fused_action_head_kernel(grp_ref, len_ref,
                              act_ref, srep_ref, srepT_ref, smask_ref,
                              p2_ln_w_ref, p2_ln_b_ref, p2_w_ref, p2_b_ref,
                              w_in_ref, w_mem_ref, scale_ref,
                              head_w_ref, head_b_ref, head_ln_w_ref, head_ln_b_ref,
                              lin_wt_ref, lin_b_ref,
                              o_ref):
    del grp_ref  # only used inside index_maps (state gather)
    i = pl.program_id(0)
    Lc, D = act_ref.shape[1], act_ref.shape[2]
    f32, bf16 = jnp.float32, jnp.bfloat16

    # --- pooler2: LN -> Linear(D,D) -> tanh on the action embedding ---
    x = act_ref[0]                                                       # (Lc, D) f32
    xn = _layernorm(x, p2_ln_w_ref[...], p2_ln_b_ref[...])
    c = jnp.tanh(jnp.dot(xn.astype(bf16), p2_w_ref[...],
                         preferred_element_type=f32) + p2_b_ref[...])    # "context" (f32)

    m = srep_ref[0]                                                      # (Ls, D) bf16 pooled state
    m_t = srepT_ref[0]                                                   # (D, Ls) bf16 pre-transposed
    mask = smask_ref[0]                                                  # (1, Ls) f32

    # --- BiAttention ---
    # input_dot = context @ W_in^T as a VPU multiply + lane reduce (no N=1 MXU push)
    input_dot = jnp.sum(c * w_in_ref[...], axis=-1, keepdims=True)       # (Lc, 1)
    # memory_dot / cross_dot contract against the pre-transposed state (no in-kernel XLU xpose)
    memory_dot = jnp.dot(w_mem_ref[...], m_t, preferred_element_type=f32)            # (1, Ls)
    cross_dot = jnp.dot((c * scale_ref[...]).astype(bf16), m_t,
                        preferred_element_type=f32)                                   # (Lc, Ls)
    att = input_dot + memory_dot + cross_dot
    att = att - 1e30 * (1.0 - mask)       # NOTE: assumes at least one unmasked state token

    row_max = jnp.max(att, axis=-1, keepdims=True)                       # (Lc, 1)
    e1 = jnp.exp(att - row_max)
    w1 = e1 / jnp.sum(e1, axis=-1, keepdims=True)
    out1 = jnp.dot(w1.astype(bf16), m, preferred_element_type=f32)       # (Lc, D)

    # weight_two softmax over ALL Lc rows (matches the reference, which pads to 128 before
    # the encoder); out2 on the MXU via a TN dot (p^T @ c), as in flash-attention backward.
    rm = row_max - jnp.max(row_max)
    e2 = jnp.exp(rm)
    w2 = e2 / jnp.sum(e2)                                                # (Lc, 1)
    out2 = lax.dot_general(w2.astype(bf16), c.astype(bf16),
                           (((0,), (0,)), ((), ())),
                           preferred_element_type=f32)                   # (1, D)

    # --- head: Linear(4D, 2D) with the concat([c, out1, c*out1, out2*out1]) folded into
    #     four (D, 2D) weight blocks -> four clean MXU accumulations, no lane concat ---
    y = jnp.dot(c.astype(bf16), head_w_ref[0:D, :], preferred_element_type=f32)
    y = y + jnp.dot(out1.astype(bf16), head_w_ref[D:2 * D, :], preferred_element_type=f32)
    y = y + jnp.dot((c * out1).astype(bf16), head_w_ref[2 * D:3 * D, :],
                    preferred_element_type=f32)
    y = y + jnp.dot((out2 * out1).astype(bf16), head_w_ref[3 * D:4 * D, :],
                    preferred_element_type=f32)
    y = y + head_b_ref[...]
    yn = _layernorm(y, head_ln_w_ref[...], head_ln_b_ref[...])
    g = 0.5 * yn * (1.0 + _erf_f32(yn * 0.7071067811865476))             # exact-erf GELU

    # --- get_aggregated(..., 'mean') over the first len[i] tokens + final Linear ---
    length = len_ref[i]                                                  # scalar from SMEM
    seq_mask = (lax.broadcasted_iota(jnp.int32, (Lc, 1), 0) < length).astype(jnp.float32)
    denom = jnp.maximum(jnp.sum(seq_mask), 1.0)                          # guard empty mask
    avg = jnp.sum(g * seq_mask, axis=0, keepdims=True) / denom           # (1, 2D)

    C = lin_wt_ref.shape[0]
    if C == 1:
        # num_classes == 1: VPU multiply-reduce instead of a C=1 MXU matmul (f32 on VPU)
        val = jnp.sum(avg * lin_wt_ref[...], axis=-1, keepdims=True) + lin_b_ref[...]
    else:
        val = lax.dot_general(avg.astype(bf16), lin_wt_ref[...].astype(bf16),
                              (((1,), (1,)), ((), ())),
                              preferred_element_type=f32) + lin_b_ref[...]
    o_ref[0] = val                                                       # (1, C)


def fused_action_head_forward(group_idx, lens, act_emb, state_rep, state_rep_t,
                              state_mask, params):
    B_a, Lc, D = act_emb.shape
    B_s, Ls, _ = state_rep.shape
    pp2, pa, ph, plin = params["pooler2"], params["attn"], params["head"], params["linear"]
    C = plin["w"].shape[1]
    bf16 = jnp.bfloat16

    bcast = lambda i, grp, ln: (0, 0)
    # grid-invariant weights: single-buffered (no double-buffer VMEM cost, no pipelining loss)
    wspec = lambda shape: pl.BlockSpec(shape, bcast, pipeline_mode=pl.Buffered(1))

    grid_spec = pltpu.PrefetchScalarGridSpec(
        num_scalar_prefetch=2,                      # group index + per-action lengths (SMEM)
        grid=(B_a,),
        in_specs=[
            pl.BlockSpec((1, Lc, D), lambda i, grp, ln: (i, 0, 0)),        # action embedding
            pl.BlockSpec((1, Ls, D), lambda i, grp, ln: (grp[i], 0, 0)),   # gathered state rep
            pl.BlockSpec((1, D, Ls), lambda i, grp, ln: (grp[i], 0, 0)),   # gathered state rep^T
            pl.BlockSpec((1, 1, Ls), lambda i, grp, ln: (grp[i], 0, 0)),   # gathered state mask
            wspec((1, D)),              # pooler2 ln_w
            wspec((1, D)),              # pooler2 ln_b
            wspec((D, D)),              # pooler2 w  (bf16)
            wspec((1, D)),              # pooler2 b
            wspec((1, D)),              # attn w_in  (f32, VPU)
            wspec((1, D)),              # attn w_mem (bf16, MXU)
            wspec((1, D)),              # attn dot_scale
            wspec((4 * D, 2 * D)),      # head w (bf16)
            wspec((1, 2 * D)),          # head b
            wspec((1, 2 * D)),          # head ln_w
            wspec((1, 2 * D)),          # head ln_b
            wspec((C, 2 * D)),          # final linear w (pre-transposed)
            wspec((1, C)),              # final linear b
        ],
        out_specs=pl.BlockSpec((1, 1, C), lambda i, grp, ln: (i, 0, 0)),
    )
    return pl.pallas_call(
        _fused_action_head_kernel,
        out_shape=jax.ShapeDtypeStruct((B_a, 1, C), jnp.float32),
        grid_spec=grid_spec,
        compiler_params=pltpu.CompilerParams(
            dimension_semantics=("parallel",),       # independent steps -> v7x megacore
            vmem_limit_bytes=64 * 1024 * 1024),
    )(group_idx, lens,
      act_emb, state_rep, state_rep_t, state_mask.reshape(B_s, 1, Ls),
      pp2["ln_w"].reshape(1, D), pp2["ln_b"].reshape(1, D),
      pp2["w"].astype(bf16), pp2["b"].reshape(1, D),
      pa["w_in"].reshape(1, D), pa["w_mem"].reshape(1, D).astype(bf16),
      pa["dot_scale"].reshape(1, D),
      ph["w"].astype(bf16), ph["b"].reshape(1, 2 * D),
      ph["ln_w"].reshape(1, 2 * D), ph["ln_b"].reshape(1, 2 * D),
      plin["w"].T, plin["b"].reshape(1, C))


# ----------------------------------------------------------------------------
# Parameter init (deterministic, synthetic) and BEiT3 stub
# ----------------------------------------------------------------------------

def _trunc_normal(key, shape, std=0.02):
    # matches trunc_normal_(std=std, a=-std, b=std): truncation at +-1 sigma
    return std * jax.random.truncated_normal(key, -1.0, 1.0, shape, jnp.float32)


def init_params(key, vocab_size, D, num_classes, patch_dim):
    ks = jax.random.split(key, 10)
    params = {
        "token_embed": _trunc_normal(ks[0], (vocab_size, D)),
        "patch_proj_w": _trunc_normal(ks[1], (patch_dim, D)),
        "patch_proj_b": jnp.zeros((D,), jnp.float32),
        "pooler": dict(ln_w=jnp.ones((D,), jnp.float32), ln_b=jnp.zeros((D,), jnp.float32),
                       w=_trunc_normal(ks[2], (D, D)), b=jnp.zeros((D,), jnp.float32)),
        "pooler2": dict(ln_w=jnp.ones((D,), jnp.float32), ln_b=jnp.zeros((D,), jnp.float32),
                        w=_trunc_normal(ks[3], (D, D)), b=jnp.zeros((D,), jnp.float32)),
        "attn": dict(w_in=_trunc_normal(ks[4], (D,)),
                     w_mem=_trunc_normal(ks[5], (D,)),
                     dot_scale=jax.random.uniform(ks[6], (D,), jnp.float32,
                                                  minval=1.0 / math.sqrt(D), maxval=1.0)),
        "head": dict(w=_trunc_normal(ks[7], (4 * D, 2 * D)), b=jnp.zeros((2 * D,), jnp.float32),
                     ln_w=jnp.ones((2 * D,), jnp.float32), ln_b=jnp.zeros((2 * D,), jnp.float32)),
        "linear": dict(w=_trunc_normal(ks[8], (2 * D, num_classes)),
                       b=jnp.zeros((num_classes,), jnp.float32)),
    }
    return params


def beit3_stub(params, textual_tokens, visual_tokens, text_padding_position):
    # TODO(synk): the BEiT3 multiway-transformer encoder definition is not provided in the
    # reference source; replaced by a deterministic embedding stub (token lookup + linear
    # patch projection).  The VQA head downstream of the encoder is the Pallas hot path.
    txt = params["token_embed"][textual_tokens]                 # (B, Lt, D)
    mask = text_padding_position.astype(jnp.float32)            # (B, Lt)
    if visual_tokens is None:
        return {"encoder_embedding": txt, "encoder_padding_mask": mask}
    # layout: images are NCHW (B, C, H, W) like PyTorch; patchified with 8x8 patches.
    B, C, H, W = visual_tokens.shape
    P = 8
    x = visual_tokens.reshape(B, C, H // P, P, W // P, P)
    x = x.transpose(0, 2, 4, 1, 3, 5).reshape(B, (H // P) * (W // P), C * P * P)
    vis = jnp.dot(x, params["patch_proj_w"]) + params["patch_proj_b"]  # (B, Np, D)
    emb = jnp.concatenate([vis, txt], axis=1)
    mask = jnp.concatenate([jnp.zeros((B, vis.shape[1]), jnp.float32), mask], axis=1)
    return {"encoder_embedding": emb, "encoder_padding_mask": mask}


# ----------------------------------------------------------------------------
# Full forward pass (mirrors BEiT3ForVisualQuestionAnswering.forward)
# ----------------------------------------------------------------------------

def vqa_forward(params, state_input_ids, state_attention_mask,
                action_input_ids, action_attention_mask, sizes,
                images=None, labels=None):
    sizes = [int(s) for s in sizes]                         # sizes.tolist()
    Lc = 128
    pad = Lc - action_input_ids.shape[-1]
    action_input_ids = jnp.pad(action_input_ids, ((0, 0), (0, pad)), constant_values=1)
    action_attention_mask = jnp.pad(action_attention_mask, ((0, 0), (0, pad)), constant_values=0)

    state_outputs = beit3_stub(params, state_input_ids, images, state_attention_mask)
    action_outputs = beit3_stub(params, action_input_ids, None, action_attention_mask)

    # state pooler: row-tiled matmul over all B_s*Ls tokens, emitted in bf16 (matmul operand)
    pp = params["pooler"]
    se = state_outputs["encoder_embedding"]                 # (B_s, Ls, D)
    B_s, Ls, D = se.shape
    state_rep = pooler_forward(se.reshape(B_s * Ls, D),
                               pp["ln_w"], pp["ln_b"], pp["w"], pp["b"]).reshape(B_s, Ls, D)
    # one-time host transpose (hoisted out of the per-action kernel steps)
    state_rep_t = jnp.transpose(state_rep, (0, 2, 1))       # (B_s, D, Ls)
    state_mask = state_outputs["encoder_padding_mask"]      # (B_s, Ls)

    # action-row -> state-row mapping (replaces host-side repeat + concatenate over `sizes`)
    group_idx = jnp.repeat(jnp.arange(len(sizes), dtype=jnp.int32),
                           jnp.asarray(sizes, dtype=jnp.int32),
                           total_repeat_length=sum(sizes))
    lens = jnp.sum(action_attention_mask, axis=1).astype(jnp.int32)        # (B_a,)

    # fused: pooler2 -> BiAttention -> head -> masked mean -> final Linear
    act_values = fused_action_head_forward(group_idx, lens,
                                           action_outputs["encoder_embedding"],
                                           state_rep, state_rep_t, state_mask,
                                           params)                          # (B_a, 1, C)
    act_values = act_values.reshape(act_values.shape[0], -1)
    if act_values.shape[1] == 1:                                            # .squeeze(1)
        act_values = act_values[:, 0]

    # segmented log-softmax over groups (single dispatch set), then split into the
    # reference's list-of-logits format
    n_groups = len(sizes)
    gmax = jax.ops.segment_max(act_values, group_idx, num_segments=n_groups)
    shifted = act_values - gmax[group_idx]
    gsum = jax.ops.segment_sum(jnp.exp(shifted), group_idx, num_segments=n_groups)
    log_sm = shifted - jnp.log(gsum)[group_idx]

    offsets = [0]
    for s in sizes:
        offsets.append(offsets[-1] + s)
    logits = [log_sm[offsets[i]:offsets[i + 1]] for i in range(n_groups)]

    loss = None
    if labels is not None:
        loss = -sum(logit[label] for logit, label in zip(logits, labels)) / len(logits)
    return {"loss": loss, "logits": logits}


# ----------------------------------------------------------------------------
# Driver
# ----------------------------------------------------------------------------

if __name__ == "__main__":
    key = jax.random.PRNGKey(0)
    D = 32                      # encoder_embed_dim
    vocab = 64
    num_classes = 1
    B_s = 2                     # number of states
    sizes = [2, 1]              # actions per state -> B_a = 3
    B_a = sum(sizes)
    L_state_txt = 12            # state text length (stub encoder adds 4 visual tokens -> 16)
    L_action = 8                # raw action length (padded to 128 inside forward)
    C, H, W, P = 3, 16, 16, 8
    patch_dim = C * P * P

    k_param, k_state, k_action, k_img = jax.random.split(key, 4)
    params = init_params(k_param, vocab, D, num_classes, patch_dim)

    state_input_ids = jax.random.randint(k_state, (B_s, L_state_txt), 0, vocab, dtype=jnp.int32)
    state_attention_mask = jnp.concatenate(
        [jnp.zeros((B_s, L_state_txt - 3), jnp.int32), jnp.ones((B_s, 3), jnp.int32)], axis=1)
    action_input_ids = jax.random.randint(k_action, (B_a, L_action), 0, vocab, dtype=jnp.int32)
    action_lens = jnp.array([5, 6, 4], dtype=jnp.int32)
    action_attention_mask = (jnp.arange(L_action)[None, :] < action_lens[:, None]).astype(jnp.int32)
    images = jax.random.normal(k_img, (B_s, C, H, W), jnp.float32)
    sizes_arr = jnp.array(sizes, dtype=jnp.int32)

    out = vqa_forward(params, state_input_ids, state_attention_mask,
                      action_input_ids, action_attention_mask, sizes_arr, images=images)
    for lg in out["logits"]:
        jax.block_until_ready(lg)
    print("KERNEL_OK")
</pallas_src>

<mosaic_0001>
module attributes {stable_mosaic.version = 11 : i64} {
  func.func @_pooler_kernel(%arg0: i32, %arg1: memref<32x32xf32, #tpu.memory_space<vmem>>, %arg2: memref<1x32xf32, #tpu.memory_space<vmem>>, %arg3: memref<1x32xf32, #tpu.memory_space<vmem>>, %arg4: memref<32x32xbf16, #tpu.memory_space<vmem>>, %arg5: memref<1x32xf32, #tpu.memory_space<vmem>>, %arg6: memref<32x32xbf16, #tpu.memory_space<vmem>>) attributes {dimension_semantics = [#tpu.dimension_semantics<parallel>], iteration_bounds = array<i64: 1>, scalar_prefetch = 0 : i64, scratch_operands = 0 : i64, tpu.core_type = #tpu.core_type<tc>, window_params = [{transform_indices = @transform_0, window_bounds = array<i64: 32, 32>}, {pipeline_mode = #tpu.pipeline_mode<synchronous>, transform_indices = @transform_1, window_bounds = array<i64: 1, 32>}, {pipeline_mode = #tpu.pipeline_mode<synchronous>, transform_indices = @transform_2, window_bounds = array<i64: 1, 32>}, {pipeline_mode = #tpu.pipeline_mode<synchronous>, transform_indices = @transform_3, window_bounds = array<i64: 32, 32>}, {pipeline_mode = #tpu.pipeline_mode<synchronous>, transform_indices = @transform_4, window_bounds = array<i64: 1, 32>}, {transform_indices = @transform_5, window_bounds = array<i64: 32, 32>}]} {
    %c0 = arith.constant 0 : index
    %c0_0 = arith.constant 0 : index
    %0 = vector.load %arg1[%c0, %c0_0] : memref<32x32xf32, #tpu.memory_space<vmem>>, vector<32x32xf32>
    %c0_1 = arith.constant 0 : index
    %c0_2 = arith.constant 0 : index
    %1 = vector.load %arg2[%c0_1, %c0_2] : memref<1x32xf32, #tpu.memory_space<vmem>>, vector<1x32xf32>
    %c0_3 = arith.constant 0 : index
    %c0_4 = arith.constant 0 : index
    %2 = vector.load %arg3[%c0_3, %c0_4] : memref<1x32xf32, #tpu.memory_space<vmem>>, vector<1x32xf32>
    %cst = arith.constant dense<0.000000e+00> : vector<32xf32>
    %3 = vector.multi_reduction <add>, %0, %cst [1] : vector<32x32xf32> to vector<32xf32>
    %4 = vector.shape_cast %3 : vector<32xf32> to vector<32x1xf32>
    %cst_5 = arith.constant 3.200000e+01 : f32
    %5 = vector.broadcast %cst_5 : f32 to vector<32x1xf32>
    %6 = arith.divf %4, %5 : vector<32x1xf32>
    %7 = vector.broadcast %6 : vector<32x1xf32> to vector<32x32xf32>
    %8 = arith.subf %0, %7 : vector<32x32xf32>
    %9 = arith.mulf %8, %8 : vector<32x32xf32>
    %cst_6 = arith.constant dense<0.000000e+00> : vector<32xf32>
    %10 = vector.multi_reduction <add>, %9, %cst_6 [1] : vector<32x32xf32> to vector<32xf32>
    %11 = vector.shape_cast %10 : vector<32xf32> to vector<32x1xf32>
    %cst_7 = arith.constant 3.200000e+01 : f32
    %12 = vector.broadcast %cst_7 : f32 to vector<32x1xf32>
    %13 = arith.divf %11, %12 : vector<32x1xf32>
    %14 = vector.broadcast %6 : vector<32x1xf32> to vector<32x32xf32>
    %15 = arith.subf %0, %14 : vector<32x32xf32>
    %cst_8 = arith.constant 9.99999974E-6 : f32
    %16 = vector.broadcast %cst_8 : f32 to vector<32x1xf32>
    %17 = arith.addf %13, %16 : vector<32x1xf32>
    %18 = math.rsqrt %17 : vector<32x1xf32>
    %19 = vector.broadcast %18 : vector<32x1xf32> to vector<32x32xf32>
    %20 = arith.mulf %15, %19 : vector<32x32xf32>
    %21 = vector.broadcast %1 : vector<1x32xf32> to vector<32x32xf32>
    %22 = arith.mulf %20, %21 : vector<32x32xf32>
    %23 = vector.broadcast %2 : vector<1x32xf32> to vector<32x32xf32>
    %24 = arith.addf %22, %23 : vector<32x32xf32>
    %25 = arith.truncf %24 : vector<32x32xf32> to vector<32x32xbf16>
    %c0_9 = arith.constant 0 : index
    %c0_10 = arith.constant 0 : index
    %26 = vector.load %arg4[%c0_9, %c0_10] : memref<32x32xbf16, #tpu.memory_space<vmem>>, vector<32x32xbf16>
    %cst_11 = arith.constant dense<0.000000e+00> : vector<32x32xf32>
    %27 = tpu.matmul %25, %26, %cst_11 {dimension_numbers = #tpu.dot_dimension_numbers<[1], [0], [0], [1], [0, 0, 1, 1], [], []>} : vector<32x32xbf16>, vector<32x32xbf16>, vector<32x32xf32> -> vector<32x32xf32>
    %c0_12 = arith.constant 0 : index
    %c0_13 = arith.constant 0 : index
    %28 = vector.load %arg5[%c0_12, %c0_13] : memref<1x32xf32, #tpu.memory_space<vmem>>, vector<1x32xf32>
    %29 = vector.broadcast %28 : vector<1x32xf32> to vector<32x32xf32>
    %30 = arith.addf %27, %29 : vector<32x32xf32>
    %31 = math.tanh %30 : vector<32x32xf32>
    %32 = arith.truncf %31 : vector<32x32xf32> to vector<32x32xbf16>
    %c0_14 = arith.constant 0 : index
    %c0_15 = arith.constant 0 : index
    %33 = vector.load %arg6[%c0_14, %c0_15] : memref<32x32xbf16, #tpu.memory_space<vmem>>, vector<32x32xbf16>
    tpu.vector_store %arg6[%c0_14, %c0_15], %32 {strides = array<i32>} : memref<32x32xbf16, #tpu.memory_space<vmem>>, vector<32x32xbf16>,
    return
  }
  func.func @transform_0(%arg0: i32) -> (i32, i32) {
    %c0_i32 = arith.constant 0 : i32
    %c0_i32_0 = arith.constant 0 : i32
    return %arg0, %c0_i32 : i32, i32
  }
  func.func @transform_1(%arg0: i32) -> (i32, i32) {
    %c0_i32 = arith.constant 0 : i32
    %c0_i32_0 = arith.constant 0 : i32
    %c0_i32_1 = arith.constant 0 : i32
    return %c0_i32, %c0_i32_0 : i32, i32
  }
  func.func @transform_2(%arg0: i32) -> (i32, i32) {
    %c0_i32 = arith.constant 0 : i32
    %c0_i32_0 = arith.constant 0 : i32
    %c0_i32_1 = arith.constant 0 : i32
    return %c0_i32, %c0_i32_0 : i32, i32
  }
  func.func @transform_3(%arg0: i32) -> (i32, i32) {
    %c0_i32 = arith.constant 0 : i32
    %c0_i32_0 = arith.constant 0 : i32
    %c0_i32_1 = arith.constant 0 : i32
    return %c0_i32, %c0_i32_0 : i32, i32
  }
  func.func @transform_4(%arg0: i32) -> (i32, i32) {
    %c0_i32 = arith.constant 0 : i32
    %c0_i32_0 = arith.constant 0 : i32
    %c0_i32_1 = arith.constant 0 : i32
    return %c0_i32, %c0_i32_0 : i32, i32
  }
  func.func @transform_5(%arg0: i32) -> (i32, i32) {
    %c0_i32 = arith.constant 0 : i32
    %c0_i32_0 = arith.constant 0 : i32
    return %arg0, %c0_i32 : i32, i32
  }
}

</mosaic_0001>

<bundles_post_ra>
// kernel: tpu_custom_call.1
= control target key start
LH: loop header
LB: loop body
LE: loop exit
PB: predicated region body
PF: predicated region fallthrough
CT: control target
= control target key end

     0   :  { %10 = vsyncpa [#allocation3], 0  ;;  %s618_s0 = inlined_call_operand.hbm [shape: f32[32,32], index: 0, kind: input, shape index: {}]   ;;  %s619_s1 = inlined_call_operand.hbm [shape: f32[1,32], index: 1, kind: input, shape index: {}]   ;;  %s620_s2 = inlined_call_operand.hbm [shape: f32[1,32], index: 2, kind: input, shape index: {}]   ;;  %s621_s3 = inlined_call_operand.hbm [shape: bf16[32,32], index: 3, kind: input, shape index: {}]   ;;  %s622_s4 = inlined_call_operand.hbm [shape: f32[1,32], index: 4, kind: input, shape index: {}]   ;;  %s623_s5 = inlined_call_operand.hbm [shape: bf16[32,32], index: 5, kind: output, shape index: {}]  }
   0x1   :  { %11 = vsyncpa [#allocation6], 0 }
   0x2   :  { %12 = vsyncpa [#allocation9], 0 }
   0x3   :  { %13 = vsyncpa [#allocation4], 0  ;;  %s483_s18 = smov [#allocation5]   ;;  %s484_s20 = smov [#allocation8]  }
   0x4   :  { %s32_s19 = sshll.u32 %s483_s18, 4  ;;  %s51_s21 = sshll.u32 %s484_s20, 4  ;;  %s33_s19 = int_to_ptr.vmem [resolvable:$true] %s32_s19  ;;  %s523_s21 = int_to_ptr.vmem [resolvable:$true] %s51_s21 }
   0x5   :  { %s343_s24 = scalar_lea.hbm %s619_s1, 16 }
   0x6   :  { %p344_p0 = scmp.ne.s32.totalorder %s619_s1, %s343_s24  ;;  %p347_p1 = scmp.lt.u32.totalorder %s343_s24, %s619_s1 }
   0x8   :  { %p349_p2 = pnand %p347_p1, %p344_p0 }
   0xa   :  { %352 = shalt.err (!%p349_p2)
}
   0xb   :  { %s353_s29 = scalar_lea.vmem %s33_s19, 16  ;;  %s357_s30 = scalar_lea.vmem %s33_s19, 32 }
   0xc   :  { %p354_p3 = scmp.ne.s32.totalorder %s33_s19, %s353_s29  ;;  %p358_p4 = scmp.lt.s32.totalorder %s33_s19, %s33_s19 }
   0xd   :  { %p359_p5 = scmp.lt.s32.totalorder %s357_s30, %s353_s29 }
   0xf   :  { %p360_p6 = por %p359_p5, %p358_p4 }
  0x11   :  { %p361_p7 = pnand %p360_p6, %p354_p3 }
  0x13   :  { %364 = shalt.err (!%p361_p7)
}
  0x14   :  { %35 = dma.hbm_to_vmem [thread:$0]  %s619_s1, 16, %s33_s19, [#allocation6]  }
  0x15   :  { %s365_s10 = scalar_lea.hbm %s621_s3, 256 }
  0x16   :  { %p366_p8 = scmp.ne.s32.totalorder %s621_s3, %s365_s10  ;;  %p369_p9 = scmp.lt.u32.totalorder %s365_s10, %s621_s3 }
  0x18   :  { %p371_p10 = pnand %p369_p9, %p366_p8 }
  0x1a   :  { %374 = shalt.err (!%p371_p10)
}
  0x1b   :  { %s375_s15 = scalar_lea.vmem %s523_s21, 256  ;;  %p380_p12 = scmp.lt.s32.totalorder %s523_s21, %s523_s21 }
  0x1c   :  { %p376_p11 = scmp.ne.s32.totalorder %s523_s21, %s375_s15  ;;  %p381_p13 = scmp.lt.s32.totalorder %s375_s15, %s375_s15 }
  0x1e   :  { %p382_p0 = por %p381_p13, %p380_p12 }
  0x20   :  { %p383_p1 = pnand %p382_p0, %p376_p11 }
  0x22   :  { %386 = shalt.err (!%p383_p1)
}
  0x23   :  { %s485_s1 = smov 64   ;;  %s486_s16 = smov 4  }
  0x24   :  { %57 = dma.hbm_to_vmem [thread:$0]  %s621_s3, 256, %s523_s21, [#allocation9], %s485_s1, %s485_s1, %s486_s16  }
  0x25   :  { %s487_s19 = smov [#allocation2]   ;;  %s387_s24 = scalar_lea.hbm %s618_s0, 512 }
  0x26   :  { %s19_s20 = sshll.u32 %s487_s19, 4  ;;  %p388_p2 = scmp.ne.s32.totalorder %s618_s0, %s387_s24  ;;  %s20_s20 = int_to_ptr.vmem [resolvable:$true] %s19_s20 }
  0x27   :  { %p391_p3 = scmp.lt.u32.totalorder %s387_s24, %s618_s0 }
  0x29   :  { %p393_p4 = pnand %p391_p3, %p388_p2 }
  0x2b   :  { %396 = shalt.err (!%p393_p4)
}
  0x2c   :  { %s397_s29 = scalar_lea.vmem %s20_s20, 512  ;;  %p402_p6 = scmp.lt.s32.totalorder %s20_s20, %s20_s20 }
  0x2d   :  { %p398_p5 = scmp.ne.s32.totalorder %s20_s20, %s397_s29  ;;  %p403_p7 = scmp.lt.s32.totalorder %s397_s29, %s397_s29 }
  0x2f   :  { %p404_p8 = por %p403_p7, %p402_p6 }
  0x31   :  { %p405_p9 = pnand %p404_p8, %p398_p5 }
  0x33   :  { %408 = shalt.err (!%p405_p9)
}
  0x34   :  { %s488_s3 = smov 128   ;;  %s489_s21 = smov 8  }
  0x35   :  { %25 = dma.hbm_to_vmem [thread:$0]  %s618_s0, 512, %s20_s20, [#allocation3], %s488_s3, %s488_s3, %s489_s21  }
  0x36   :  { %s490_s7 = smov [#allocation7]   ;;  %s491_s9 = smov [#allocation10]  }
  0x37   :  { %s42_s8 = sshll.u32 %s490_s7, 4  ;;  %s64_s10 = sshll.u32 %s491_s9, 4  ;;  %s43_s8 = int_to_ptr.vmem [resolvable:$true] %s42_s8  ;;  %s65_s10 = int_to_ptr.vmem [resolvable:$true] %s64_s10 }
  0x38   :  { %s409_s13 = scalar_lea.hbm %s620_s2, 16 }
  0x39   :  { %p410_p10 = scmp.ne.s32.totalorder %s620_s2, %s409_s13  ;;  %p413_p11 = scmp.lt.u32.totalorder %s409_s13, %s620_s2 }
  0x3b   :  { %p415_p12 = pnand %p413_p11, %p410_p10 }
  0x3d   :  { %418 = shalt.err (!%p415_p12)
}
  0x3e   :  { %s419_s0 = scalar_lea.vmem %s43_s8, 16  ;;  %s423_s19 = scalar_lea.vmem %s43_s8, 32 }
  0x3f   :  { %p420_p13 = scmp.ne.s32.totalorder %s43_s8, %s419_s0  ;;  %p424_p0 = scmp.lt.s32.totalorder %s43_s8, %s43_s8 }
  0x40   :  { %p425_p1 = scmp.lt.s32.totalorder %s423_s19, %s419_s0 }
  0x42   :  { %p426_p2 = por %p425_p1, %p424_p0 }
  0x44   :  { %p427_p3 = pnand %p426_p2, %p420_p13 }
  0x46   :  { %430 = shalt.err (!%p427_p3)
}
  0x47   :  { %45 = dma.hbm_to_vmem [thread:$0]  %s620_s2, 16, %s43_s8, [#allocation6]  }
  0x48   :  { %s431_s25 = scalar_lea.hbm %s622_s4, 16 }
  0x49   :  { %p432_p4 = scmp.ne.s32.totalorder %s622_s4, %s431_s25  ;;  %p435_p5 = scmp.lt.u32.totalorder %s431_s25, %s622_s4 }
  0x4b   :  { %p437_p6 = pnand %p435_p5, %p432_p4 }
  0x4d   :  { %440 = shalt.err (!%p437_p6)
}
  0x4e   :  { %s441_s3 = scalar_lea.vmem %s65_s10, 16  ;;  %s445_s21 = scalar_lea.vmem %s65_s10, 32 }
  0x4f   :  { %p442_p7 = scmp.ne.s32.totalorder %s65_s10, %s441_s3  ;;  %p446_p8 = scmp.lt.s32.totalorder %s65_s10, %s65_s10 }
  0x50   :  { %p447_p9 = scmp.lt.s32.totalorder %s445_s21, %s441_s3 }
  0x52   :  { %p448_p10 = por %p447_p9, %p446_p8 }
  0x54   :  { %p449_p11 = pnand %p448_p10, %p442_p7 }
  0x56   :  { %452 = shalt.err (!%p449_p11)
}
  0x57   :  { %67 = dma.hbm_to_vmem [thread:$0]  %s622_s4, 16, %s65_s10, [#allocation9]  }
  0x58   :  { %475 = dma.done.wait [#allocation3], 512  }
  0x59   :  { %476 = vsyncadd [#allocation3], 4294966784 }
  0x5a   :  { %477 = dma.done.wait [#allocation6], 32  }
  0x5b   :  { %478 = vsyncadd [#allocation6], 4294967264 }
  0x5c   :  { %479 = dma.done.wait [#allocation9], 272  }
  0x5d   :  { %480 = vsyncadd [#allocation9], 4294967024  ;;  %vm90_vm0 = vcmask 261120   ;;  %v84_v0 = vld [vmem:[#allocation2] sm:$0xff]  ;;  %v86_v1 = vld [vmem:[#allocation2 + $0x10] sm:$0xff]  ;;  %vm264_vm1 = vcmask 257024  }
  0x5e   :  { %v85_v2 = vld [vmem:[#allocation2 + $0x8] sm:$0xff]  ;;  %v91_v3 = vsel %vm90_vm0, %v84_v0, 0.0  ;;  %v97_v4 = vsel %vm90_vm0, %v86_v1, 0.0  ;;  %v87_v5 = vld [vmem:[#allocation2 + $0x18] sm:$0xff]  ;;  %v288_v44 = vld [vmem:[#allocation5] ss:$0 sm:$0xff] }
  0x5f   :  { %92 = vadd.xlane.f32.xlu0 %v91_v3  ;;  %98 = vadd.xlane.f32.xlu1 %v97_v4  ;;  %v94_v6 = vsel %vm90_vm0, %v85_v2, 0.0  ;;  %v100_v7 = vsel %vm90_vm0, %v87_v5, 0.0  ;;  %v325_v28 = vld [vmem:[#allocation8] sm:$0xff]   ;;  %v326_v29 = vld [vmem:[#allocation8 + $0x8] sm:$0xff]   ;;  %v289_v50 = vld [vmem:[#allocation7] ss:$0 sm:$0xff] }
  0x60   :  { %307 = vmatprep.subr.bf16.mxu0 %v325_v28  ;;  %v290_v62 = vld [vmem:[#allocation10] ss:$0 sm:$0xff]  ;;  %s492_s4 = smov [#allocation11]  }
  0x61   :  { %308 = vmatpush3.bf16.msra.mxu0 %v325_v28  ;;  %s274_s6 = sshll.u32 %s492_s4, 4  ;;  %s275_s6 = int_to_ptr.vmem [resolvable:$true] %s274_s6 }
  0x62   :  { %309 = vmatprep.subr.bf16.mxu0 %v326_v29  ;;  %s453_s7 = scalar_lea.vmem %s275_s6, 256  ;;  %p458_p13 = scmp.lt.s32.totalorder %s275_s6, %s275_s6 }
  0x63   :  { %95 = vadd.xlane.f32.xlu0 %v94_v6  ;;  %101 = vadd.xlane.f32.xlu1 %v100_v7  ;;  %p454_p12 = scmp.ne.s32.totalorder %s275_s6, %s453_s7  ;;  %p459_p0 = scmp.lt.s32.totalorder %s453_s7, %s453_s7 }
  0x65   :  { %310 = vmatpush3.bf16.msra.mxu0 %v326_v29  ;;  %p460_p1 = por %p459_p0, %p458_p13 }
  0x67   :  { %p461_p2 = pnand %p460_p1, %p454_p12 }
  0xec   :  { %v93_v8 = vpop.xlane.xlu0 %92  ;;  %v99_v9 = vpop.xlane.xlu1 %98 }
  0xed   :  { %v104_v10 = vmul.f32 0.03125, %v93_v8  ;;  %v106_v11 = vmul.f32 0.03125, %v99_v9 }
  0xef   :  { %v108_v12 = vsub.f32 %v84_v0, %v104_v10  ;;  %v110_v13 = vsub.f32 %v86_v1, %v106_v11 }
  0xf0   :  { %v96_v14 = vpop.xlane.xlu0 %95  ;;  %v102_v15 = vpop.xlane.xlu1 %101 }
  0xf1   :  { %v105_v16 = vmul.f32 0.03125, %v96_v14  ;;  %v107_v17 = vmul.f32 0.03125, %v102_v15  ;;  %v112_v18 = vmul.f32 %v108_v12, %v108_v12  ;;  %v114_v19 = vmul.f32 %v110_v13, %v110_v13 }
  0xf3   :  { %v109_v20 = vsub.f32 %v85_v2, %v105_v16  ;;  %v111_v21 = vsub.f32 %v87_v5, %v107_v17  ;;  %v116_v22 = vsel %vm90_vm0, %v112_v18, 0.0  ;;  %v122_v23 = vsel %vm90_vm0, %v114_v19, 0.0 }
  0xf4   :  { %117 = vadd.xlane.f32.xlu0 %v116_v22 }
  0xf5   :  { %v113_v24 = vmul.f32 %v109_v20, %v109_v20  ;;  %v115_v25 = vmul.f32 %v111_v21, %v111_v21 }
  0xf7   :  { %v119_v26 = vsel %vm90_vm0, %v113_v24, 0.0  ;;  %v125_v27 = vsel %vm90_vm0, %v115_v25, 0.0 }
  0xf8   :  { %123 = vadd.xlane.f32.xlu0 %v122_v23  ;;  %120 = vadd.xlane.f32.xlu1 %v119_v26 }
  0xfc   :  { %126 = vadd.xlane.f32.xlu1 %v125_v27 }
 0x181   :  { %v118_v30 = vpop.xlane.xlu0 %117 }
 0x182   :  { %v128_v31 = vmul.f32 0.03125, %v118_v30 }
 0x184   :  { %v132_v32 = vadd.f32 1e-05, %v128_v31 }
 0x185   :  { %v121_v33 = vpop.xlane.xlu1 %120  ;;  %v124_v34 = vpop.xlane.xlu0 %123 }
 0x186   :  { %327 = vrsqrt.f32 %v132_v32  ;;  %v129_v35 = vmul.f32 0.03125, %v121_v33  ;;  %v130_v36 = vmul.f32 0.03125, %v124_v34 }
 0x188   :  { %v133_v37 = vadd.f32 1e-05, %v129_v35  ;;  %v134_v38 = vadd.f32 1e-05, %v130_v36 }
 0x189   :  { %v127_v39 = vpop.xlane.xlu1 %126 }
 0x18a   :  { %329 = vrsqrt.f32 %v133_v37  ;;  %v131_v40 = vmul.f32 0.03125, %v127_v39 }
 0x18b   :  { %331 = vrsqrt.f32 %v134_v38 }
 0x18c   :  { %v135_v41 = vadd.f32 1e-05, %v131_v40 }
 0x18e   :  { %333 = vrsqrt.f32 %v135_v41 }
 0x190   :  { %v328_v42 = vpop.eup %327 }
 0x191   :  { %v140_v43 = vmul.f32 %v328_v42, %v108_v12 }
 0x193   :  { %v150_v48 = vmul.f32 %v288_v44, %v140_v43 }
 0x194   :  { %v330_v45 = vpop.eup %329 }
 0x195   :  { %v332_v46 = vpop.eup %331  ;;  %v141_v47 = vmul.f32 %v330_v45, %v109_v20  ;;  %v160_v54 = vadd.f32 %v289_v50, %v150_v48 }
 0x196   :  { %v142_v49 = vmul.f32 %v332_v46, %v110_v13 }
 0x197   :  { %v151_v51 = vmul.f32 %v288_v44, %v141_v47 }
 0x198   :  { %v334_v52 = vpop.eup %333  ;;  %v152_v56 = vmul.f32 %v288_v44, %v142_v49 }
 0x199   :  { %v143_v53 = vmul.f32 %v334_v52, %v111_v21  ;;  %v161_v55 = vadd.f32 %v289_v50, %v151_v51 }
 0x19a   :  { %v162_v59 = vadd.f32 %v289_v50, %v152_v56 }
 0x19b   :  { %v164_v57 = vpack.c.bf16 %v161_v55, %v160_v54  ;;  %v153_v58 = vmul.f32 %v288_v44, %v143_v53 }
 0x19d   :  { %311 = vmatprep.mubr.msk.bf16.mxu0 %vm90_vm0, %v164_v57  ;;  %v163_v60 = vadd.f32 %v289_v50, %v153_v58 }
 0x19f   :  { %v165_v61 = vpack.c.bf16 %v163_v60, %v162_v59 }
 0x1a1   :  { %312 = vmatmul.mubr.msk.bf16.vlgmr.msra.gmra.mrb[0].mxu0 %vm90_vm0, %v165_v61 }
 0x274   :  { %v313_v63 = vpop.f32.mrb[0].mxu0 }
 0x275   :  { %v238_v0 = vadd.f32 %v313_v63, %v290_v62  ;;  %v229_v1 = vpop.f32.mrb[1].mxu0 }
 0x276   :  { %v230_v2 = vadd.f32 %v290_v62, %v229_v1  ;;  %v314_v3 = vpop.f32.mrb[2].mxu0 }
 0x277   :  { %335 = vtanh.f32 %v238_v0  ;;  %v241_v4 = vadd.f32 %v314_v3, %v290_v62  ;;  %v232_v5 = vpop.f32.mrb[3].mxu0 }
 0x278   :  { %337 = vtanh.f32 %v230_v2  ;;  %v233_v6 = vadd.f32 %v290_v62, %v232_v5 }
 0x279   :  { %339 = vtanh.f32 %v241_v4 }
 0x27a   :  { %341 = vtanh.f32 %v233_v6 }
 0x281   :  { %v336_v7 = vpop.eup %335 }
 0x282   :  { %v338_v8 = vpop.eup %337  ;;  %v301_v9 = vpack.c.bf16 %v336_v7, %v336_v7 }
 0x283   :  { %v340_v10 = vpop.eup %339  ;;  %v299_v11 = vpack.c.bf16 %v338_v8, %v338_v8 }
 0x284   :  { %v342_v12 = vpop.eup %341  ;;  %267 = vst.msk [vmem:[#allocation11 + $0x8] sm:$0xf] %vm264_vm1, %v301_v9  ;;  %v302_v13 = vpack.c.bf16 %v340_v10, %v340_v10 }
 0x285   :  { %265 = vst.msk [vmem:[#allocation11] sm:$0xf] %vm264_vm1, %v299_v11  ;;  %v300_v14 = vpack.c.bf16 %v342_v12, %v342_v12 }
 0x286   :  { %268 = vst.msk [vmem:[#allocation11 + $0xc] sm:$0xf] %vm264_vm1, %v302_v13 }
 0x287   :  { %266 = vst.msk [vmem:[#allocation11 + $0x4] sm:$0xf] %vm264_vm1, %v300_v14 }
 0x288   :  { %464 = shalt.err (!%p461_p2)
}
 0x289   :  { %s465_s10 = scalar_lea.hbm %s623_s5, 256 }
 0x28a   :  { %p466_p3 = scmp.ne.s32.totalorder %s623_s5, %s465_s10  ;;  %p469_p4 = scmp.lt.u32.totalorder %s465_s10, %s623_s5 }
 0x28c   :  { %p471_p5 = pnand %p469_p4, %p466_p3 }
 0x28e   :  { %474 = shalt.err (!%p471_p5)
}
 0x28f   :  { %280 = dma.vmem_to_hbm [thread:$0]  %s275_s6, 256, %s623_s5, [#allocation4], %s485_s1, %s485_s1, %s486_s16  }
 0x290   :  { %481 = dma.done.wait [#allocation4], 256  }
 0x291   :  { %482 = vsyncadd [#allocation4], 4294967040 }
 0x292   :  { %284 = vsyncpa [#allocation3], 1 }
 0x293   :  { %285 = vsyncpa [#allocation6], 1 }
 0x294   :  { %286 = vsyncpa [#allocation9], 1 }
 0x295   :  { %287 = vsyncpa [#allocation4], 1 }

</bundles_post_ra>
